<compile_context>
chip_gen: v5e
topology: v5e:2x2
jax: 0.10.0
libtpu: 0.0.40
codegen_flags: <defaults>
</compile_context>

<pallas_src>
import functools
from typing import NamedTuple

import jax
import jax.numpy as jnp
from jax.experimental import pallas as pl
from jax.experimental.pallas import tpu as pltpu


def _round_up(a: int, b: int) -> int:
    return (a + b - 1) // b * b


def _cdiv(a: int, b: int) -> int:
    return (a + b - 1) // b


@functools.lru_cache(maxsize=1)
def _vmem_capacity_bytes() -> int:
    try:
        return int(pltpu.get_tpu_info().vmem_capacity_bytes)
    except Exception:
        return 64 * 1024 * 1024  # conservative default (v7x per-TC VMEM)


def _vmem_limit_bytes() -> int:
    # ~75% of physical VMEM, capped at 100 MiB: 48 MiB on v7x, 96 MiB on v5e/v6e.
    return min(_vmem_capacity_bytes() * 3 // 4, 100 * 1024 * 1024)


def _tile_vmem_bytes(tm, tk, tn, x_isz, w_isz, o_isz):
    """Estimated VMEM footprint: double-buffered I/O tiles + f32 accumulator."""
    return (2 * tm * tk * x_isz             # x double buffer
            + 2 * tk * (2 * tn) * w_isz     # packed weight double buffer
            + 2 * (2 * tn) * 4              # packed bias double buffer
            + 2 * tm * tn * o_isz           # output double buffer
            + tm * (2 * tn) * 4)            # f32 accumulator (scratch)


class GLUParams(NamedTuple):
    w_packed: jax.Array   # (k_p, 2*n_p): per output tile j, [Wv tile | Wg tile]
    b_packed: jax.Array   # (1, 2*n_p):   per output tile j, [bv tile | bg tile]
    dim_in: int
    dim_out: int
    k_p: int
    n_p: int
    tn: int
    tk: int


def prepare_glu_params(weight, bias, *, tn=None, tk=None) -> GLUParams:
    """One-time (parameter-load-time) preprocessing of the nn.Linear params.

    weight: (2*dim_out, dim_in)   -- torch nn.Linear layout
    bias:   (2*dim_out,)
    Keeps the per-call hot path free of transposes / pads / weight copies.
    """
    two_dim_out, dim_in = weight.shape
    assert two_dim_out % 2 == 0
    dim_out = two_dim_out // 2
    assert bias.shape == (two_dim_out,)

    w_isz = jnp.dtype(weight.dtype).itemsize
    budget = int(_vmem_limit_bytes() * 0.9)

    if tn is None:
        tn = min(512, _round_up(dim_out, 128))
    if tk is None:
        tk = min(1024, _round_up(dim_in, 128))
    # Ensure a reference tm=512 pipeline (worst case: f32 activations) fits
    # the VMEM budget; shrink tk first, then tn.
    while _tile_vmem_bytes(512, tk, tn, 4, w_isz, 4) > budget and tk > 128:
        tk = max(128, tk // 2)
    while _tile_vmem_bytes(512, tk, tn, 4, w_isz, 4) > budget and tn > 128:
        tn = max(128, tn // 2)

    k_p = _round_up(dim_in, tk)
    n_p = _round_up(dim_out, tn)
    nj = n_p // tn

    # Split value / gate halves, transpose to (K, N), zero-pad to tile
    # multiples, then interleave per output tile so the weight block at
    # (k, j) of shape (tk, 2*tn) is [value cols of tile j | gate cols of tile j].
    wv = jnp.pad(weight[:dim_out, :].T, ((0, k_p - dim_in), (0, n_p - dim_out)))
    wg = jnp.pad(weight[dim_out:, :].T, ((0, k_p - dim_in), (0, n_p - dim_out)))
    w_packed = jnp.concatenate(
        [wv.reshape(k_p, nj, tn), wg.reshape(k_p, nj, tn)], axis=2
    ).reshape(k_p, 2 * n_p)

    bv = jnp.pad(bias[:dim_out], (0, n_p - dim_out))
    bg = jnp.pad(bias[dim_out:], (0, n_p - dim_out))
    b_packed = jnp.concatenate(
        [bv.reshape(nj, tn), bg.reshape(nj, tn)], axis=1
    ).reshape(1, 2 * n_p)

    return GLUParams(w_packed=w_packed, b_packed=b_packed, dim_in=dim_in,
                     dim_out=dim_out, k_p=k_p, n_p=n_p, tn=tn, tk=tk)


def _glu_kernel(x_ref, w_ref, b_ref, o_ref, acc_ref, *, tn, activation):
    k = pl.program_id(2)

    @pl.when(k == 0)
    def _():
        acc_ref[...] = jnp.zeros_like(acc_ref)

    # One fused dot per k-step: (tm, tk) @ (tk, 2*tn) -> (tm, 2*tn) f32 acc.
    acc_ref[...] += jnp.dot(x_ref[...], w_ref[...],
                            preferred_element_type=jnp.float32)

    @pl.when(k == pl.num_programs(2) - 1)
    def _():
        acc = acc_ref[...] + b_ref[...].astype(jnp.float32)
        v, g = acc[:, :tn], acc[:, tn:]          # lane-aligned static split
        if activation == "silu":
            act_g = g * jax.nn.sigmoid(g)              # sigmoid -> EUP
        elif activation == "gelu":
            act_g = jax.nn.gelu(g, approximate=False)  # exact erf (torch default)
        else:
            raise ValueError(f"unsupported activation: {activation}")
        o_ref[...] = (v * act_g).astype(o_ref.dtype)


def glu_apply(x, params: GLUParams, *, activation="silu"):
    """Hot path: fused x @ [Wv | Wg] + b, chunk, v * act(gate)."""
    orig_shape = x.shape
    dim_in = orig_shape[-1]
    assert dim_in == params.dim_in
    dim_out, tn, tk = params.dim_out, params.tn, params.tk
    k_p, n_p = params.k_p, params.n_p

    x2 = x.reshape(-1, dim_in)
    rows = x2.shape[0]

    x_isz = jnp.dtype(x.dtype).itemsize
    w_isz = jnp.dtype(params.w_packed.dtype).itemsize
    b_isz = jnp.dtype(params.b_packed.dtype).itemsize
    budget = int(_vmem_limit_bytes() * 0.9)

    # ---- pick tm ------------------------------------------------------------
    tm = min(1024, _round_up(rows, 8))
    # Keep >= 2 row tiles when the N grid collapses to one tile so both of
    # v7x's TensorCores get work along the parallel row axis.
    if n_p == tn and rows > 512:
        tm = min(tm, 512)
    # Shrink tm to divide rows tightly (same tile count, less padded compute).
    if rows > tm:
        tm = _round_up(_cdiv(rows, _cdiv(rows, tm)), 8)
    # Fit the VMEM budget (double-buffered tiles + f32 accumulator).
    while _tile_vmem_bytes(tm, tk, tn, x_isz, w_isz, x_isz) > budget and tm > 8:
        tm = _round_up(max(8, tm // 2), 8)

    rows_p = _round_up(rows, tm)
    if rows_p != rows or k_p != dim_in:
        x2 = jnp.pad(x2, ((0, rows_p - rows), (0, k_p - dim_in)))

    grid = (rows_p // tm, n_p // tn, k_p // tk)
    gi, gj, _ = grid

    cost = pl.CostEstimate(
        # 2 * M * K * (2N) matmul flops + epilogue (bias, sigmoid-mul, gate-mul).
        flops=4 * rows_p * k_p * n_p + 8 * rows_p * n_p,
        transcendentals=rows_p * n_p,
        # Account for operand re-reads across the grid.
        bytes_accessed=(gj * rows_p * k_p * x_isz
                        + gi * k_p * 2 * n_p * w_isz
                        + gi * 2 * n_p * b_isz
                        + rows_p * n_p * x_isz),
    )

    kernel = functools.partial(_glu_kernel, tn=tn, activation=activation)

    out = pl.pallas_call(
        kernel,
        out_shape=jax.ShapeDtypeStruct((rows_p, n_p), x.dtype),
        grid_spec=pltpu.PrefetchScalarGridSpec(
            num_scalar_prefetch=0,
            grid=grid,
            in_specs=[
                pl.BlockSpec((tm, tk), lambda i, j, k: (i, k)),        # x
                pl.BlockSpec((tk, 2 * tn), lambda i, j, k: (k, j)),    # packed W
                pl.BlockSpec((1, 2 * tn), lambda i, j, k: (0, j)),     # packed b
            ],
            out_specs=pl.BlockSpec((tm, tn), lambda i, j, k: (i, j)),
            scratch_shapes=[pltpu.VMEM((tm, 2 * tn), jnp.float32)],    # fused acc
        ),
        compiler_params=pltpu.CompilerParams(
            dimension_semantics=("parallel", "parallel", "arbitrary"),
            vmem_limit_bytes=_vmem_limit_bytes(),
        ),
        cost_estimate=cost,
    )(x2, params.w_packed, params.b_packed)

    if rows_p != rows or n_p != dim_out:
        out = out[:rows, :dim_out]
    return out.reshape(*orig_shape[:-1], dim_out)


def glu(x, weight, bias, *, activation="silu"):
    """Convenience wrapper (prep + apply).  For repeated calls, run
    prepare_glu_params once at parameter-load time and glu_apply per step."""
    return glu_apply(x, prepare_glu_params(weight, bias), activation=activation)


if __name__ == "__main__":
    key = jax.random.PRNGKey(0)
    k_x, k_w, k_b = jax.random.split(key, 3)

    batch, seq, dim_in, dim_out = 2, 8, 32, 64

    x = jax.random.normal(k_x, (batch, seq, dim_in), dtype=jnp.float32)
    # torch nn.Linear layout: weight (2*dim_out, dim_in), bias (2*dim_out,)
    weight = jax.random.normal(k_w, (2 * dim_out, dim_in),
                               dtype=jnp.float32) / (dim_in ** 0.5)
    bias = jax.random.normal(k_b, (2 * dim_out,), dtype=jnp.float32) * 0.1

    # Parameter-load-time prep (once), then the hot-path apply.
    params = prepare_glu_params(weight, bias)
    out = glu_apply(x, params, activation="silu")
    out = jax.block_until_ready(out)

    # Plain-JAX reference with identical semantics (SiLU gate).
    proj = jnp.einsum("bsd,nd->bsn", x, weight,
                      precision=jax.lax.Precision.HIGHEST) + bias
    v_ref, g_ref = proj[..., :dim_out], proj[..., dim_out:]
    ref = v_ref * (g_ref * jax.nn.sigmoid(g_ref))

    assert out.shape == ref.shape, f"shape mismatch {out.shape} vs {ref.shape}"
    assert jnp.allclose(out, ref, atol=1e-3, rtol=1e-3), "mismatch vs reference"

    print("KERNEL_OK")
</pallas_src>

<mosaic_0001>
module attributes {stable_mosaic.version = 11 : i64} {
  func.func @_glu_kernel(%arg0: i32, %arg1: i32, %arg2: i32, %arg3: memref<16x128xf32, #tpu.memory_space<vmem>>, %arg4: memref<128x256xf32, #tpu.memory_space<vmem>>, %arg5: memref<1x256xf32, #tpu.memory_space<vmem>>, %arg6: memref<16x128xf32, #tpu.memory_space<vmem>>, %arg7: memref<16x256xf32, #tpu.memory_space<vmem>>) attributes {dimension_semantics = [#tpu.dimension_semantics<parallel>, #tpu.dimension_semantics<parallel>, #tpu.dimension_semantics<arbitrary>], iteration_bounds = array<i64: 1, 1, 1>, scalar_prefetch = 0 : i64, scratch_operands = 1 : i64, tpu.core_type = #tpu.core_type<tc>, window_params = [{transform_indices = @transform_0, window_bounds = array<i64: 16, 128>}, {transform_indices = @transform_1, window_bounds = array<i64: 128, 256>}, {transform_indices = @transform_2, window_bounds = array<i64: 1, 256>}, {transform_indices = @transform_3, window_bounds = array<i64: 16, 128>}]} {
    %c0_i32 = arith.constant 0 : i32
    %0 = arith.cmpi eq, %arg2, %c0_i32 : i32
    %1 = arith.extui %0 : i1 to i32
    %c0_i32_0 = arith.constant 0 : i32
    %2 = arith.cmpi ne, %1, %c0_i32_0 : i32
    scf.if %2 {
      %cst_10 = arith.constant 0.000000e+00 : f32
      %12 = vector.broadcast %cst_10 : f32 to vector<16x256xf32>
      %c0_11 = arith.constant 0 : index
      %c0_12 = arith.constant 0 : index
      %13 = vector.load %arg7[%c0_11, %c0_12] : memref<16x256xf32, #tpu.memory_space<vmem>>, vector<16x256xf32>
      tpu.vector_store %arg7[%c0_11, %c0_12], %12 {strides = array<i32>} : memref<16x256xf32, #tpu.memory_space<vmem>>, vector<16x256xf32>,
    } else {
    }
    %c0 = arith.constant 0 : index
    %c0_1 = arith.constant 0 : index
    %3 = vector.load %arg7[%c0, %c0_1] : memref<16x256xf32, #tpu.memory_space<vmem>>, vector<16x256xf32>
    %c0_2 = arith.constant 0 : index
    %c0_3 = arith.constant 0 : index
    %4 = vector.load %arg3[%c0_2, %c0_3] : memref<16x128xf32, #tpu.memory_space<vmem>>, vector<16x128xf32>
    %c0_4 = arith.constant 0 : index
    %c0_5 = arith.constant 0 : index
    %5 = vector.load %arg4[%c0_4, %c0_5] : memref<128x256xf32, #tpu.memory_space<vmem>>, vector<128x256xf32>
    %cst = arith.constant dense<0.000000e+00> : vector<16x256xf32>
    %6 = tpu.matmul %4, %5, %cst {dimension_numbers = #tpu.dot_dimension_numbers<[1], [0], [0], [1], [0, 0, 1, 1], [], []>} : vector<16x128xf32>, vector<128x256xf32>, vector<16x256xf32> -> vector<16x256xf32>
    %7 = arith.addf %3, %6 : vector<16x256xf32>
    %c0_6 = arith.constant 0 : index
    %c0_7 = arith.constant 0 : index
    %8 = vector.load %arg7[%c0_6, %c0_7] : memref<16x256xf32, #tpu.memory_space<vmem>>, vector<16x256xf32>
    tpu.vector_store %arg7[%c0_6, %c0_7], %7 {strides = array<i32>} : memref<16x256xf32, #tpu.memory_space<vmem>>, vector<16x256xf32>,
    %c0_i32_8 = arith.constant 0 : i32
    %9 = arith.cmpi eq, %arg2, %c0_i32_8 : i32
    %10 = arith.extui %9 : i1 to i32
    %c0_i32_9 = arith.constant 0 : i32
    %11 = arith.cmpi ne, %10, %c0_i32_9 : i32
    scf.if %11 {
      %c0_10 = arith.constant 0 : index
      %c0_11 = arith.constant 0 : index
      %12 = vector.load %arg7[%c0_10, %c0_11] : memref<16x256xf32, #tpu.memory_space<vmem>>, vector<16x256xf32>
      %c0_12 = arith.constant 0 : index
      %c0_13 = arith.constant 0 : index
      %13 = vector.load %arg5[%c0_12, %c0_13] : memref<1x256xf32, #tpu.memory_space<vmem>>, vector<1x256xf32>
      %14 = vector.broadcast %13 : vector<1x256xf32> to vector<16x256xf32>
      %15 = arith.addf %12, %14 : vector<16x256xf32>
      %16 = vector.extract_strided_slice %15 {offsets = [0, 0], sizes = [16, 128], strides = [1, 1]} : vector<16x256xf32> to vector<16x128xf32>
      %17 = vector.extract_strided_slice %15 {offsets = [0, 128], sizes = [16, 128], strides = [1, 1]} : vector<16x256xf32> to vector<16x128xf32>
      %18 = arith.negf %17 : vector<16x128xf32>
      %19 = math.exp %18 : vector<16x128xf32>
      %cst_14 = arith.constant 1.000000e+00 : f32
      %20 = vector.broadcast %cst_14 : f32 to vector<16x128xf32>
      %21 = arith.addf %20, %19 : vector<16x128xf32>
      %22 = arith.divf %20, %21 : vector<16x128xf32>
      %23 = arith.mulf %17, %22 : vector<16x128xf32>
      %24 = arith.mulf %16, %23 : vector<16x128xf32>
      %c0_15 = arith.constant 0 : index
      %c0_16 = arith.constant 0 : index
      %25 = vector.load %arg6[%c0_15, %c0_16] : memref<16x128xf32, #tpu.memory_space<vmem>>, vector<16x128xf32>
      tpu.vector_store %arg6[%c0_15, %c0_16], %24 {strides = array<i32>} : memref<16x128xf32, #tpu.memory_space<vmem>>, vector<16x128xf32>,
    } else {
    }
    return
  }
  func.func @transform_0(%arg0: i32, %arg1: i32, %arg2: i32) -> (i32, i32) {
    %c0_i32 = arith.constant 0 : i32
    return %arg0, %arg2 : i32, i32
  }
  func.func @transform_1(%arg0: i32, %arg1: i32, %arg2: i32) -> (i32, i32) {
    %c0_i32 = arith.constant 0 : i32
    return %arg2, %arg1 : i32, i32
  }
  func.func @transform_2(%arg0: i32, %arg1: i32, %arg2: i32) -> (i32, i32) {
    %c0_i32 = arith.constant 0 : i32
    %c0_i32_0 = arith.constant 0 : i32
    return %c0_i32, %arg1 : i32, i32
  }
  func.func @transform_3(%arg0: i32, %arg1: i32, %arg2: i32) -> (i32, i32) {
    %c0_i32 = arith.constant 0 : i32
    return %arg0, %arg1 : i32, i32
  }
}

</mosaic_0001>

<bundles_post_ra>
// kernel: tpu_custom_call.1
= control target key start
LH: loop header
LB: loop body
LE: loop exit
PB: predicated region body
PF: predicated region fallthrough
CT: control target
= control target key end

     0   :  { %8 = vsyncpa [#allocation4], 0  ;;  %s439_s0 = inlined_call_operand.hbm [shape: f32[16,128], index: 0, kind: input, shape index: {}]   ;;  %s440_s1 = inlined_call_operand.hbm [shape: f32[128,256], index: 1, kind: input, shape index: {}]   ;;  %s441_s2 = inlined_call_operand.hbm [shape: f32[1,256], index: 2, kind: input, shape index: {}]   ;;  %s442_s3 = inlined_call_operand.hbm [shape: f32[16,128], index: 3, kind: output, shape index: {}]  }
   0x1   :  { %9 = vsyncpa [#allocation7], 0  ;;  %s28_s14 = sshll.u32 %s440_s1, 4  ;;  %s29_s14 = int_to_ptr.hbm [resolvable:$true] %s28_s14 }
   0x2   :  { %10 = vsyncpa [#allocation5], 0  ;;  %s393_s15 = smov [#allocation6]   ;;  %s15_s19 = sshll.u32 %s439_s0, 4  ;;  %s16_s19 = int_to_ptr.hbm [resolvable:$true] %s15_s19 }
   0x3   :  { %s30_s16 = sshll.u32 %s393_s15, 4  ;;  %s394_s20 = smov 256   ;;  %s31_s16 = int_to_ptr.vmem [resolvable:$true] %s30_s16 }
   0x4   :  { %s395_s21 = smov 16   ;;  %s396_s22 = smov [#allocation3]  }
   0x5   :  { %36 = dma.hbm_to_vmem [thread:$0]  %s29_s14, 4096, %s31_s16, [#allocation7], %s394_s20, %s394_s20, %s395_s21  }
   0x6   :  { %s17_s23 = sshll.u32 %s396_s22, 4  ;;  %s397_s24 = smov 128   ;;  %s18_s23 = int_to_ptr.vmem [resolvable:$true] %s17_s23 }
   0x7   :  { %s398_s25 = smov 8   ;;  %s42_s27 = sshll.u32 %s441_s2, 4  ;;  %s43_s27 = int_to_ptr.hbm [resolvable:$true] %s42_s27 }
   0x8   :  { %23 = dma.hbm_to_vmem [thread:$0]  %s16_s19, 256, %s18_s23, [#allocation4], %s397_s24, %s397_s24, %s398_s25  }
   0x9   :  { %s399_s28 = smov [#allocation8]  }
   0xa   :  { %s44_s0 = sshll.u32 %s399_s28, 4  ;;  %s45_s0 = int_to_ptr.vmem [resolvable:$true] %s44_s0 }
   0xb   :  { %47 = dma.hbm_to_vmem [thread:$0]  %s43_s27, 32, %s45_s0, [#allocation7]  }
   0xc   :  { %387 = dma.done.wait [#allocation4], 256  }
   0xd   :  { %388 = vsyncadd [#allocation4], 4294967040 }
   0xe   :  { %389 = dma.done.wait [#allocation7], 4128  }
   0xf   :  { %390 = vsyncadd [#allocation7], 4294963168  ;;  %v105_v0 = vld [vmem:[#allocation6 + $0xf8] sm:$0xff]  ;;  %v103_v1 = vld [vmem:[#allocation6 + $0xe8] sm:$0xff]  ;;  %s400_s2 = smov [#allocation9]   ;;  %s227_s5 = sshll.u32 %s442_s3, 4  ;;  %s228_s5 = int_to_ptr.hbm [resolvable:$true] %s227_s5 }
  0x10   :  { %129 = vmatpush.msra.mxu1 %v105_v0  ;;  %259 = vmatpush.msra.mxu3 %v105_v0  ;;  %v101_v2 = vld [vmem:[#allocation6 + $0xd8] sm:$0xff]  ;;  %v99_v3 = vld [vmem:[#allocation6 + $0xc8] sm:$0xff]  ;;  %v104_v4 = vld [vmem:[#allocation6 + $0xf0] sm:$0xff]  ;;  %s225_s29 = sshll.u32 %s400_s2, 4  ;;  %s226_s29 = int_to_ptr.vmem [resolvable:$true] %s225_s29 }
  0x11   :  { %v97_v5 = vld [vmem:[#allocation6 + $0xb8] sm:$0xff]  ;;  %106 = vmatpush.msra.mxu0 %v104_v4  ;;  %243 = vmatpush.msra.mxu2 %v104_v4  ;;  %v102_v6 = vld [vmem:[#allocation6 + $0xe0] sm:$0xff]  ;;  %v100_v7 = vld [vmem:[#allocation6 + $0xd0] sm:$0xff] }
  0x12   :  { %130 = vmatpush.msra.mxu1 %v103_v1  ;;  %260 = vmatpush.msra.mxu3 %v103_v1  ;;  %v95_v8 = vld [vmem:[#allocation6 + $0xa8] sm:$0xff]  ;;  %v98_v9 = vld [vmem:[#allocation6 + $0xc0] sm:$0xff]  ;;  %v93_v10 = vld [vmem:[#allocation6 + $0x98] sm:$0xff] }
  0x13   :  { %107 = vmatpush.msra.mxu0 %v102_v6  ;;  %244 = vmatpush.msra.mxu2 %v102_v6  ;;  %v96_v11 = vld [vmem:[#allocation6 + $0xb0] sm:$0xff]  ;;  %v91_v12 = vld [vmem:[#allocation6 + $0x88] sm:$0xff]  ;;  %v94_v13 = vld [vmem:[#allocation6 + $0xa0] sm:$0xff] }
  0x14   :  { %131 = vmatpush.msra.mxu1 %v101_v2  ;;  %261 = vmatpush.msra.mxu3 %v101_v2  ;;  %v89_v14 = vld [vmem:[#allocation6 + $0x78] sm:$0xff]  ;;  %v92_v15 = vld [vmem:[#allocation6 + $0x90] sm:$0xff]  ;;  %v87_v16 = vld [vmem:[#allocation6 + $0x68] sm:$0xff] }
  0x15   :  { %108 = vmatpush.msra.mxu0 %v100_v7  ;;  %245 = vmatpush.msra.mxu2 %v100_v7  ;;  %v90_v17 = vld [vmem:[#allocation6 + $0x80] sm:$0xff]  ;;  %v85_v18 = vld [vmem:[#allocation6 + $0x58] sm:$0xff]  ;;  %v88_v19 = vld [vmem:[#allocation6 + $0x70] sm:$0xff] }
  0x16   :  { %132 = vmatpush.msra.mxu1 %v99_v3  ;;  %262 = vmatpush.msra.mxu3 %v99_v3  ;;  %v83_v20 = vld [vmem:[#allocation6 + $0x48] sm:$0xff]  ;;  %v86_v21 = vld [vmem:[#allocation6 + $0x60] sm:$0xff]  ;;  %v81_v22 = vld [vmem:[#allocation6 + $0x38] sm:$0xff] }
  0x17   :  { %109 = vmatpush.msra.mxu0 %v98_v9  ;;  %246 = vmatpush.msra.mxu2 %v98_v9  ;;  %v84_v23 = vld [vmem:[#allocation6 + $0x50] sm:$0xff]  ;;  %v79_v24 = vld [vmem:[#allocation6 + $0x28] sm:$0xff]  ;;  %v82_v25 = vld [vmem:[#allocation6 + $0x40] sm:$0xff] }
  0x18   :  { %133 = vmatpush.msra.mxu1 %v97_v5  ;;  %263 = vmatpush.msra.mxu3 %v97_v5  ;;  %v77_v26 = vld [vmem:[#allocation6 + $0x18] sm:$0xff]  ;;  %v80_v27 = vld [vmem:[#allocation6 + $0x30] sm:$0xff]  ;;  %v75_v28 = vld [vmem:[#allocation6 + $0x8] sm:$0xff] }
  0x19   :  { %110 = vmatpush.msra.mxu0 %v96_v11  ;;  %247 = vmatpush.msra.mxu2 %v96_v11  ;;  %v72_v29 = vld [vmem:[#allocation3] sm:$0xff]  ;;  %v73_v30 = vld [vmem:[#allocation3 + $0x8] sm:$0xff]  ;;  %v78_v31 = vld [vmem:[#allocation6 + $0x20] sm:$0xff] }
  0x1a   :  { %134 = vmatpush.msra.mxu1 %v95_v8  ;;  %264 = vmatpush.msra.mxu3 %v95_v8  ;;  %v76_v32 = vld [vmem:[#allocation6 + $0x10] sm:$0xff]  ;;  %v74_v33 = vld [vmem:[#allocation6] sm:$0xff] }
  0x1b   :  { %111 = vmatpush.msra.mxu0 %v94_v13  ;;  %248 = vmatpush.msra.mxu2 %v94_v13  ;;  %v167_v34 = vld [vmem:[#allocation8] sm:$0x3] }
  0x1c   :  { %135 = vmatpush.msra.mxu1 %v93_v10  ;;  %265 = vmatpush.msra.mxu3 %v93_v10  ;;  %v170_v35 = vperm.slane %v167_v34, 1  ;;  %v169_v50 = vperm.slane %v167_v34, 0 }
  0x1d   :  { %112 = vmatpush.msra.mxu0 %v92_v15  ;;  %249 = vmatpush.msra.mxu2 %v92_v15 }
  0x1e   :  { %136 = vmatpush.msra.mxu1 %v91_v12  ;;  %266 = vmatpush.msra.mxu3 %v91_v12 }
  0x1f   :  { %113 = vmatpush.msra.mxu0 %v90_v17  ;;  %250 = vmatpush.msra.mxu2 %v90_v17 }
  0x20   :  { %137 = vmatpush.msra.mxu1 %v89_v14  ;;  %267 = vmatpush.msra.mxu3 %v89_v14 }
  0x21   :  { %114 = vmatpush.msra.mxu0 %v88_v19  ;;  %251 = vmatpush.msra.mxu2 %v88_v19 }
  0x22   :  { %138 = vmatpush.msra.mxu1 %v87_v16  ;;  %268 = vmatpush.msra.mxu3 %v87_v16 }
  0x23   :  { %115 = vmatpush.msra.mxu0 %v86_v21  ;;  %252 = vmatpush.msra.mxu2 %v86_v21 }
  0x24   :  { %139 = vmatpush.msra.mxu1 %v85_v18  ;;  %269 = vmatpush.msra.mxu3 %v85_v18 }
  0x25   :  { %116 = vmatpush.msra.mxu0 %v84_v23  ;;  %253 = vmatpush.msra.mxu2 %v84_v23 }
  0x26   :  { %140 = vmatpush.msra.mxu1 %v83_v20  ;;  %270 = vmatpush.msra.mxu3 %v83_v20 }
  0x27   :  { %117 = vmatpush.msra.mxu0 %v82_v25  ;;  %254 = vmatpush.msra.mxu2 %v82_v25 }
  0x28   :  { %141 = vmatpush.msra.mxu1 %v81_v22  ;;  %271 = vmatpush.msra.mxu3 %v81_v22 }
  0x29   :  { %118 = vmatpush.msra.mxu0 %v80_v27  ;;  %255 = vmatpush.msra.mxu2 %v80_v27 }
  0x2a   :  { %142 = vmatpush.msra.mxu1 %v79_v24  ;;  %272 = vmatpush.msra.mxu3 %v79_v24 }
  0x2b   :  { %119 = vmatpush.msra.mxu0 %v78_v31  ;;  %256 = vmatpush.msra.mxu2 %v78_v31 }
  0x2c   :  { %143 = vmatpush.msra.mxu1 %v77_v26  ;;  %273 = vmatpush.msra.mxu3 %v77_v26 }
  0x2d   :  { %120 = vmatpush.msra.mxu0 %v76_v32  ;;  %257 = vmatpush.msra.mxu2 %v76_v32 }
  0x2e   :  { %144 = vmatpush.msra.mxu1 %v75_v28  ;;  %274 = vmatpush.msra.mxu3 %v75_v28 }
  0x2f   :  { %145 = vmatmul.f32.vlgmr.msra.gmra.mxu1 %v72_v29  ;;  %148 = vmatmul.f32.vlgmr.msra.gmra.mxu3 %v73_v30 }
  0x30   :  { %121 = vmatpush.msra.mxu0 %v74_v33  ;;  %258 = vmatpush.msra.mxu2 %v74_v33 }
  0x31   :  { %122 = vmatmul.f32.vlgmr.msra.gmra.mxu0 %v72_v29  ;;  %125 = vmatmul.f32.vlgmr.msra.gmra.mxu2 %v73_v30 }
  0xac   :  { %v146_v36 = vpop.f32.mrf.mxu1 }
  0xad   :  { %v174_v37 = vadd.f32 %v170_v35, %v146_v36 }
  0xae   :  { %v123_v54 = vpop.f32.mrf.mxu0 }
  0xaf   :  { %v241_v38 = vmul.f32 -1.442695, %v174_v37  ;;  %v173_v60 = vadd.f32 %v169_v50, %v123_v54 }
  0xb1   :  { %283 = vpow2.f32 %v241_v38 }
  0xb2   :  { %v149_v39 = vpop.f32.mrf.mxu3 }
  0xb3   :  { %v176_v40 = vadd.f32 %v170_v35, %v149_v39 }
  0xb4   :  { %v126_v2 = vpop.f32.mrf.mxu2 }
  0xb5   :  { %v242_v41 = vmul.f32 -1.442695, %v176_v40  ;;  %v175_v7 = vadd.f32 %v169_v50, %v126_v2 }
  0xb7   :  { %v284_v42 = vpop.eup %283  ;;  %285 = vpow2.f32 %v242_v41 }
  0xb8   :  { %v183_v43 = vadd.f32 1.0, %v284_v42 }
  0xba   :  { %287 = vrcp.f32 %v183_v43  ;;  %v196_v49 = vand.u32 2147483648, %v183_v43  ;;  %vm190_vm0 = vweird.f32 %v183_v43  ;;  %v194_v52 = vand.u32 2147483647, %v183_v43 }
  0xbc   :  { %v197_v57 = vor.u32 1.1754944e-38, %v196_v49  ;;  %vm195_vm3 = vcmp.eq.f32.partialorder %v194_v52, 8.507059e+37 }
  0xbd   :  { %v286_v44 = vpop.eup %285 }
  0xbe   :  { %v184_v45 = vadd.f32 1.0, %v286_v44 }
  0xc0   :  { %v288_v46 = vpop.eup %287  ;;  %289 = vrcp.f32 %v184_v45  ;;  %v211_v62 = vand.u32 2147483648, %v184_v45  ;;  %v209_v1 = vand.u32 2147483647, %v184_v45  ;;  %vm205_vm5 = vweird.f32 %v184_v45 }
  0xc1   :  { %v186_v47 = vmul.f32 %v288_v46, %v183_v43  ;;  %vm191_vm1 = vweird.f32 %v288_v46 }
  0xc2   :  { %vm192_vm2 = vmor %vm190_vm0, %vm191_vm1  ;;  %v212_v5 = vor.u32 1.1754944e-38, %v211_v62  ;;  %vm210_vm7 = vcmp.eq.f32.partialorder %v209_v1, 8.507059e+37 }
  0xc3   :  { %v187_v48 = vsub.f32 1.0, %v186_v47 }
  0xc5   :  { %v188_v51 = vmul.f32 %v288_v46, %v187_v48 }
  0xc6   :  { %v290_v53 = vpop.eup %289 }
  0xc7   :  { %v189_v55 = vadd.f32 %v288_v46, %v188_v51  ;;  %v201_v56 = vmul.f32 %v290_v53, %v184_v45  ;;  %vm206_vm4 = vweird.f32 %v290_v53 }
  0xc8   :  { %vm207_vm6 = vmor %vm205_vm5, %vm206_vm4 }
  0xc9   :  { %v193_v58 = vsel %vm192_vm2, %v288_v46, %v189_v55  ;;  %v202_v59 = vsub.f32 1.0, %v201_v56 }
  0xca   :  { %v198_v61 = vsel %vm195_vm3, %v197_v57, %v193_v58 }
  0xcb   :  { %v215_v63 = vmul.f32 %v198_v61, %v174_v37  ;;  %v203_v0 = vmul.f32 %v290_v53, %v202_v59 }
  0xcd   :  { %v204_v3 = vadd.f32 %v290_v53, %v203_v0  ;;  %v217_v4 = vmul.f32 %v215_v63, %v173_v60 }
  0xcf   :  { %v208_v6 = vsel %vm207_vm6, %v290_v53, %v204_v3  ;;  %219 = vst [vmem:[#allocation9] sm:$0xff] %v217_v4 }
  0xd0   :  { %v213_v8 = vsel %vm210_vm7, %v212_v5, %v208_v6 }
  0xd1   :  { %v216_v9 = vmul.f32 %v213_v8, %v176_v40 }
  0xd3   :  { %v218_v10 = vmul.f32 %v216_v9, %v175_v7 }
  0xd5   :  { %220 = vst [vmem:[#allocation9 + $0x8] sm:$0xff] %v218_v10 }
  0xd6   :  { %233 = dma.vmem_to_hbm [thread:$0]  %s226_s29, 256, %s228_s5, [#allocation5], %s397_s24, %s397_s24, %s398_s25  }
  0xd7   :  { %391 = dma.done.wait [#allocation5], 256  }
  0xd8   :  { %392 = vsyncadd [#allocation5], 4294967040 }
  0xd9   :  { %238 = vsyncpa [#allocation4], 1 }
  0xda   :  { %239 = vsyncpa [#allocation7], 1 }
  0xdb   :  { %240 = vsyncpa [#allocation5], 1 }

</bundles_post_ra>
